<compile_context>
chip_gen: v7x
topology: tpu7x:2x2x1
jax: 0.10.0
libtpu: 0.0.40
codegen_flags: <defaults>
</compile_context>

<pallas_src>
import jax
import jax.numpy as jnp
import numpy as np
from jax import lax
from jax.experimental import pallas as pl
from jax.experimental.pallas import tpu as pltpu


def _cdiv(a, b):
    return (a + b - 1) // b


def _round_up(a, m):
    return ((a + m - 1) // m) * m


# Largest batch tile (lanes) per grid step: 16 * 65536 * 4 B = 4 MiB of input
# per step (hits the 2-4 MiB/step target for v7x's 3.2 TB/s HBM while staying
# well under the default scoped-VMEM budgets of v5e/v6e/v7x when double-buffered).
_MAX_TILE_B = 65536


def _select_batch_tiling(B, max_tile=_MAX_TILE_B):
    """Pick (tile_b, n_steps): tile_b a multiple of 128, tile_b*n_steps >= B with
    < 128 padded lanes per step, and >= 2 grid steps whenever the batch allows it
    (so the "parallel" axis can shard across v7x's two TensorCores)."""
    B128 = _round_up(max(B, 1), 128)
    min_steps = 2 if B128 >= 256 else 1
    n_steps = max(min_steps, _cdiv(B128, max_tile))
    tile_b = _round_up(_cdiv(B128, n_steps), 128)
    return tile_b, n_steps


def fused_affine_kernel(x_ref, w_ref, b_ref, o_ref):
    # x_ref: VMEM (16, TILE_B)  -- flattened 4x4 patch on sublanes, batch on lanes
    # w_ref: VMEM (16, 1)       -- folded conv weights (column vector, resident)
    # b_ref: SMEM (1,)          -- folded bias
    # o_ref: VMEM (1, TILE_B)   -- lane-dense output row
    x = x_ref[...]                                   # (16, TILE_B)
    w = w_ref[...]                                   # (16, 1) -> lane-broadcast
    # Reduce over sublanes (axis 0), NOT lanes: result stays lane-dense.
    o_ref[...] = jnp.sum(x * w, axis=0, keepdims=True) + b_ref[0]


def fold_two_convs(w1, b1, w2, b2):
    """Fold conv2(conv1(x)) (linear, no activation) into out = <w_eff, vec(x)> + b_eff.

    Call ONCE per weight set (hoisted out of the forward path) and pass the
    result to two_conv_forward."""
    dn = ("NCHW", "OIHW", "NCHW")

    def linpart(z):  # both convs with zero bias => purely linear map
        h = lax.conv_general_dilated(z, w1, (1, 1), "VALID", dimension_numbers=dn)
        return lax.conv_general_dilated(h, w2, (1, 1), "VALID", dimension_numbers=dn)

    basis = jnp.eye(16, dtype=jnp.float32).reshape(16, 1, 4, 4)   # 16 basis images
    w_eff = linpart(basis).reshape(16, 1)                         # (16, 1)

    zero = jnp.zeros((1, 1, 4, 4), jnp.float32)                   # bias contribution
    h0 = lax.conv_general_dilated(zero, w1, (1, 1), "VALID", dimension_numbers=dn)
    h0 = h0 + b1.reshape(1, 2, 1, 1)
    o0 = lax.conv_general_dilated(h0, w2, (1, 1), "VALID", dimension_numbers=dn)
    b_eff = (o0 + b2.reshape(1, 1, 1, 1)).reshape(1)              # (1,)
    return w_eff, b_eff


@jax.jit
def two_conv_forward(x, w_eff, b_eff):
    """Forward pass of TwoConvTestModel using pre-folded weights."""
    B = x.shape[0]
    tile_b, n_steps = _select_batch_tiling(B)
    B_pad = tile_b * n_steps

    # Layout: patch on sublanes, batch on lanes.  The reshape is a free bitcast;
    # the transpose/pad producer is eligible for input fusion into the pallas
    # call (allow_input_fusion) instead of a separate HBM materialization.
    x2 = x.reshape(B, 16).T                                       # (16, B)
    x2 = jnp.pad(x2, ((0, 0), (0, B_pad - B)))                    # (16, B_pad)

    out = pl.pallas_call(
        fused_affine_kernel,
        out_shape=jax.ShapeDtypeStruct((1, B_pad), jnp.float32),
        grid=(n_steps,),
        in_specs=[
            pl.BlockSpec((16, tile_b), lambda i: (0, i)),                 # x slab
            pl.BlockSpec((16, 1), lambda i: (0, 0)),                      # w_eff (fetched once)
            pl.BlockSpec(memory_space=pltpu.MemorySpace.SMEM),            # b_eff scalar
        ],
        out_specs=pl.BlockSpec((1, tile_b), lambda i: (0, i)),            # lane-dense output
        compiler_params=pltpu.CompilerParams(
            dimension_semantics=("parallel",),
            allow_input_fusion=[True, False, False],
        ),
    )(x2, w_eff, b_eff)

    # Drop padded lanes (they contain garbage + b_eff) and return NCHW (B,1,1,1).
    return out[0, :B].reshape(B, 1, 1, 1)


def make_params():
    # conv1: fill(-1) then weight += eye(2)  -> each 2x2 kernel = [[0,-1],[-1,0]]
    w1 = jnp.full((2, 1, 2, 2), -1.0, jnp.float32) + jnp.eye(2, dtype=jnp.float32)
    b1 = jnp.full((2,), -2.0, jnp.float32)
    # conv2: fill(0) then weight += eye(3)   -> each 3x3 kernel = eye(3)
    w2 = jnp.zeros((1, 2, 3, 3), jnp.float32) + jnp.eye(3, dtype=jnp.float32)
    b2 = jnp.zeros((1,), jnp.float32)
    return w1, b1, w2, b2


def reference_forward(x, w1, b1, w2, b2):
    dn = ("NCHW", "OIHW", "NCHW")
    h = lax.conv_general_dilated(x, w1, (1, 1), "VALID", dimension_numbers=dn)
    h = h + b1.reshape(1, 2, 1, 1)
    o = lax.conv_general_dilated(h, w2, (1, 1), "VALID", dimension_numbers=dn)
    return o + b2.reshape(1, 1, 1, 1)


if __name__ == "__main__":
    key = jax.random.PRNGKey(0)
    B = 2
    x = jax.random.normal(key, (B, 1, 4, 4), dtype=jnp.float32)   # module INPUT_SHAPE=[1,1,4,4], batched

    w1, b1, w2, b2 = make_params()

    # Fold the two convs once per weight set (hoisted out of the forward path).
    w_eff, b_eff = fold_two_convs(w1, b1, w2, b2)
    w_eff, b_eff = jax.block_until_ready((w_eff, b_eff))

    out = two_conv_forward(x, w_eff, b_eff)
    out = jax.block_until_ready(out)

    ref = reference_forward(x, w1, b1, w2, b2)
    np.testing.assert_allclose(np.asarray(out), np.asarray(ref), rtol=1e-5, atol=1e-5)

    print("KERNEL_OK")
</pallas_src>

<mosaic_0001>
module attributes {stable_mosaic.version = 11 : i64} {
  func.func @fused_affine_kernel(%arg0: i32, %arg1: memref<16x128xf32, #tpu.memory_space<vmem>>, %arg2: memref<16x1xf32, #tpu.memory_space<vmem>>, %arg3: memref<1xf32, #tpu.memory_space<smem>>, %arg4: memref<1x128xf32, #tpu.memory_space<vmem>>) attributes {dimension_semantics = [#tpu.dimension_semantics<parallel>], iteration_bounds = array<i64: 1>, scalar_prefetch = 0 : i64, scratch_operands = 0 : i64, tpu.core_type = #tpu.core_type<tc>, window_params = [{transform_indices = @transform_0, window_bounds = array<i64: 16, 128>}, {pipeline_mode = #tpu.pipeline_mode<synchronous>, transform_indices = @transform_1, window_bounds = array<i64: 16, 1>}, {transform_indices = @transform_2, window_bounds = array<i64: 1>}, {transform_indices = @transform_3, window_bounds = array<i64: 1, 128>}]} {
    %c0 = arith.constant 0 : index
    %c0_0 = arith.constant 0 : index
    %0 = vector.load %arg1[%c0, %c0_0] : memref<16x128xf32, #tpu.memory_space<vmem>>, vector<16x128xf32>
    %c0_1 = arith.constant 0 : index
    %c0_2 = arith.constant 0 : index
    %1 = vector.load %arg2[%c0_1, %c0_2] : memref<16x1xf32, #tpu.memory_space<vmem>>, vector<16x1xf32>
    %2 = vector.broadcast %1 : vector<16x1xf32> to vector<16x128xf32>
    %3 = arith.mulf %0, %2 : vector<16x128xf32>
    %cst = arith.constant dense<0.000000e+00> : vector<128xf32>
    %4 = vector.multi_reduction <add>, %3, %cst [0] : vector<16x128xf32> to vector<128xf32>
    %5 = vector.shape_cast %4 : vector<128xf32> to vector<1x128xf32>
    %c0_3 = arith.constant 0 : index
    %6 = memref.load %arg3[%c0_3] : memref<1xf32, #tpu.memory_space<smem>>
    %7 = vector.broadcast %6 : f32 to vector<1x128xf32>
    %8 = arith.addf %5, %7 : vector<1x128xf32>
    %c0_4 = arith.constant 0 : index
    %c0_5 = arith.constant 0 : index
    %9 = vector.load %arg4[%c0_4, %c0_5] : memref<1x128xf32, #tpu.memory_space<vmem>>, vector<1x128xf32>
    tpu.vector_store %arg4[%c0_4, %c0_5], %8 {strides = array<i32>} : memref<1x128xf32, #tpu.memory_space<vmem>>, vector<1x128xf32>,
    return
  }
  func.func @transform_0(%arg0: i32) -> (i32, i32) {
    %c0_i32 = arith.constant 0 : i32
    %c0_i32_0 = arith.constant 0 : i32
    return %c0_i32, %arg0 : i32, i32
  }
  func.func @transform_1(%arg0: i32) -> (i32, i32) {
    %c0_i32 = arith.constant 0 : i32
    %c0_i32_0 = arith.constant 0 : i32
    %c0_i32_1 = arith.constant 0 : i32
    return %c0_i32, %c0_i32_0 : i32, i32
  }
  func.func @transform_2(%arg0: i32) -> i32 {
    %c0_i32 = arith.constant 0 : i32
    %c0_i32_0 = arith.constant 0 : i32
    return %c0_i32 : i32
  }
  func.func @transform_3(%arg0: i32) -> (i32, i32) {
    %c0_i32 = arith.constant 0 : i32
    %c0_i32_0 = arith.constant 0 : i32
    return %c0_i32, %arg0 : i32, i32
  }
}

</mosaic_0001>

<bundles_post_ra>
// kernel: two_conv_forward.2
= control target key start
LH: loop header
LB: loop body
LE: loop exit
PB: predicated region body
PF: predicated region fallthrough
CT: control target
= control target key end

     0   :  { %v69_v2 = vmov 0   ;;  %v18_v4 = vlaneseq  ;;  %s116_s0 = inlined_call_operand.vmem [shape: f32[16,1], index: 0, kind: input, shape index: {}]   ;;  %s117_s1 = inlined_call_operand.<no memory space> [shape: f32[1], index: 1, kind: input, shape index: {}]   ;;  %s118_s2 = inlined_call_operand.vmem [shape: f32[16,2], index: 2, kind: input, shape index: {}]   ;;  %s119_s3 = inlined_call_operand.<no memory space> [shape: f32[], index: 3, kind: input, shape index: {}]   ;;  %s120_s4 = inlined_call_operand.vmem [shape: f32[1,128], index: 4, kind: output, shape index: {}]  }
   0x1   :  { %v9_v0 = vstv %s119_s3  ;;  %v37_v1 = vld [vmem:[%s116_s0] sm:$0xff]  ;;  %68 = vset.pattern.permute.xlu0 %v69_v2  ;;  %v38_v3 = vld [vmem:[%s116_s0 + $0x8] sm:$0xff]  ;;  %v59_v20 = vstv %s117_s1 }
   0x2   :  { %41 = vperm.xlu0 %68, %v37_v1   ;;  %v19_v5 = vand.u32 127, %v18_v4  ;;  %v17_v6 = vld [vmem:[%s118_s2] sm:$0xff]  ;;  %v66_v7 = vld [vmem:[%s118_s2 + $0x8] sm:$0xff] }
   0x4   :  { %vm21_vm0 = vcmp.lt.s32.totalorder %v19_v5, 2 }
   0x5   :  { %v22_v9 = vsel %vm21_vm0, %v17_v6, %v9_v0  ;;  %v31_v10 = vsel %vm21_vm0, %v66_v7, %v9_v0 }
   0x6   :  { %46 = vperm.xlu0 %68, %v38_v3  }
  0x81   :  { %v42_v8 = vpop.permute.xlu0 %41 }
  0x82   :  { %v49_v12 = vmul.f32 %v42_v8, %v22_v9 }
  0x85   :  { %v47_v11 = vpop.permute.xlu0 %46 }
  0x86   :  { %v50_v13 = vmul.f32 %v47_v11, %v31_v10 }
  0x88   :  { %v51_v14 = vadd.f32 %v50_v13, %v49_v12 }
  0x8a   :  { %v52_v15 = vrot.slane %v51_v14, 4 }
  0x8c   :  { %v53_v16 = vadd.f32 %v52_v15, %v51_v14 }
  0x8e   :  { %v54_v17 = vrot.slane %v53_v16, 2 }
  0x90   :  { %v55_v18 = vadd.f32 %v54_v17, %v53_v16 }
  0x92   :  { %v56_v19 = vrot.slane %v55_v18, 1 }
  0x94   :  { %v57_v21 = vadd.f32 %v56_v19, %v55_v18 }
  0x96   :  { %v60_v22 = vadd.f32 %v59_v20, %v57_v21 }
  0x98   :  { %61 = vst [vmem:[%s120_s4] sm:$0x1] %v60_v22 }

</bundles_post_ra>
